<compile_context>
chip_gen: v7x
topology: tpu7x:2x2x1
jax: 0.10.0
libtpu: 0.0.40
codegen_flags: <defaults>
</compile_context>

<pallas_src>
import functools

import jax
import jax.numpy as jnp
import numpy as np
from jax.experimental import pallas as pl
from jax.experimental.pallas import tpu as pltpu
from jax.scipy.linalg import block_diag


def _res2block_kernel(x_ref, w_ref, b_ref, sc_ref, sh_ref, out_ref,
                      *, width, nums, T, K, dil, pad, tb):
    """One batch block (tb batch elements) per grid step.

    x_ref   : (tb, C, T)          full input (all `scale` chunks), f32
    w_ref   : (K, nums*W, nums*W) per-tap block-diagonal conv weights, bf16
    b_ref   : (nums*W, 1)         conv bias, f32
    sc_ref  : (nums*W, 1)         folded BN scale  (gamma/sqrt(var+eps)), f32
    sh_ref  : (nums*W, 1)         folded BN shift  (beta - mean*scale),   f32
    out_ref : (tb, W, T)          ONLY the first chunk is written; the rest of
                                  the (aliased) output keeps the input values
                                  (= chunks[1:], zero-copy pass-through).
    """
    n_lanes = tb * T

    # --- fold the batch block into the matmul N dimension -------------------
    # Branch channels of each batch element laid side by side along the lane
    # (time) axis -> (nums*W, tb*T).  Every slab is a full 128-lane multiple,
    # so the concatenate is vreg-aligned placement only.
    slabs = [x_ref[b, width:, :] for b in range(tb)]
    a0 = jnp.concatenate(slabs, axis=1) if tb > 1 else slabs[0]

    # local (within-batch-element) time index, used to mask conv edges and the
    # junctions between batch slabs after the lane rotation below.
    t_local = jax.lax.broadcasted_iota(jnp.int32, (1, n_lanes), 1) % T

    # --- K accumulating matmuls; tap shift via XLU roll + edge mask ----------
    acc = jnp.zeros((nums * width, n_lanes), jnp.float32)
    for k in range(K):
        s = k * dil - pad                      # signed input-time shift of tap k
        if s == 0:
            a_k = a0
        else:
            # rolled[t] = a0[t + s]  (lane rotate on the XLU, overlaps the MXU)
            a_k = pltpu.roll(a0, shift=(-s) % n_lanes, axis=1)
            valid = jnp.logical_and(t_local + s >= 0, t_local + s < T)
            a_k = jnp.where(valid, a_k, 0.0)   # zero-pad semantics of 'same' conv
        acc = acc + jnp.dot(w_ref[k], a_k.astype(jnp.bfloat16),
                            preferred_element_type=jnp.float32)

    y = acc + b_ref[...]                       # conv bias
    y = jnp.maximum(y, 0.0)                    # ReLU
    y = y * sc_ref[...] + sh_ref[...]          # BatchNorm1d (inference, folded)

    # --- res = chunks[0] + sum_i branch_i ; write only the first chunk -------
    for b in range(tb):
        res = x_ref[b, 0:width, :]             # f32 residual path
        for i in range(nums):
            res = res + y[i * width:(i + 1) * width, b * T:(b + 1) * T]
        out_ref[b, :, :] = res.astype(out_ref.dtype)


def res2block_pallas(x, weights, biases, bn_scale, bn_shift,
                     *, scale, kernels, dilation, batch_block=2):
    """x: (B, C, T) float32; weights: (nums, W, W, K) = [branch, out, in, tap]."""
    B, C, T = x.shape
    assert scale >= 2, "scale==1 is not supported (mirrors the PyTorch module)"
    width = C // scale
    assert width * scale == C
    nums = scale - 1
    K, dil = kernels, dilation
    pad = (K - 1) * dil // 2
    # 'same' conv is required for the residual add to have matching shapes.
    assert 2 * pad == (K - 1) * dil, "Res2Block requires (kernels-1)*dilation even"
    assert weights.shape == (nums, width, width, K)
    # Alignment guarantees: sublane-aligned chunk slices, lane-dense stores.
    assert width % 8 == 0, "width (channels // scale) must be a multiple of 8"
    assert T % 128 == 0, "T must be a multiple of 128 for lane-dense stores"

    tb = min(batch_block, B)
    assert B % tb == 0, "batch must be divisible by the batch block"

    # Per-tap block-diagonal weights (nums*W, nums*W), bf16 MXU operands.
    # (Do NOT fold bn_scale into the weights: ReLU sits between conv and BN.)
    w_taps = [block_diag(*[weights[i, :, :, k] for i in range(nums)])
              for k in range(K)]
    w_stack = jnp.stack(w_taps, axis=0).astype(jnp.bfloat16)  # (K, nums*W, nums*W)

    b_col = biases.reshape(nums * width, 1).astype(jnp.float32)
    sc_col = bn_scale.reshape(nums * width, 1).astype(jnp.float32)
    sh_col = bn_shift.reshape(nums * width, 1).astype(jnp.float32)

    kernel = functools.partial(_res2block_kernel, width=width, nums=nums,
                               T=T, K=K, dil=dil, pad=pad, tb=tb)

    return pl.pallas_call(
        kernel,
        out_shape=jax.ShapeDtypeStruct((B, C, T), x.dtype),
        grid=(B // tb,),
        in_specs=[
            pl.BlockSpec((tb, C, T), lambda b: (b, 0, 0)),            # x
            pl.BlockSpec((K, nums * width, nums * width), lambda b: (0, 0, 0)),
            pl.BlockSpec((nums * width, 1), lambda b: (0, 0)),        # bias
            pl.BlockSpec((nums * width, 1), lambda b: (0, 0)),        # bn scale
            pl.BlockSpec((nums * width, 1), lambda b: (0, 0)),        # bn shift
        ],
        # Only the first `width` channels are ever written; the rest of the
        # output is the aliased input (chunks[1:] pass through with zero copies).
        out_specs=pl.BlockSpec((tb, width, T), lambda b: (b, 0, 0)),
        input_output_aliases={0: 0},
        compiler_params=pltpu.CompilerParams(
            dimension_semantics=("parallel",),
            vmem_limit_bytes=32 * 1024 * 1024),
    )(x, w_stack, b_col, sc_col, sh_col)


def res2block_reference(x, weights, biases, bn_scale, bn_shift,
                        *, scale, kernels, dilation):
    """Pure-JAX reference (lax.conv) mirroring the PyTorch forward."""
    B, C, T = x.shape
    width = C // scale
    pad = (kernels - 1) * dilation // 2
    chunks = [x[:, j * width:(j + 1) * width, :] for j in range(scale)]
    res = chunks[0]
    for i in range(weights.shape[0]):
        y = jax.lax.conv_general_dilated(
            chunks[i + 1], weights[i], window_strides=(1,),
            padding=[(pad, pad)], rhs_dilation=(dilation,),
            dimension_numbers=("NCH", "OIH", "NCH"),
            precision=jax.lax.Precision.HIGHEST)
        y = y + biases[i][None, :, None]
        y = jnp.maximum(y, 0.0)
        y = y * bn_scale[i][None, :, None] + bn_shift[i][None, :, None]
        res = res + y
    return jnp.concatenate([res] + chunks[1:], axis=1)


if __name__ == "__main__":
    # Small shapes consistent with the module; width=8 (sublane-aligned chunks),
    # T=128 (lane-dense stores), B=4 with batch_block=2 so each grid step feeds
    # the MXU a 256-wide N and two "parallel" steps remain for v7x megacore.
    B, channels, T = 4, 32, 128
    scale, kernels, dilation = 4, 3, 2
    width = channels // scale
    nums = scale - 1
    eps = 1e-5

    key = jax.random.PRNGKey(0)
    kx, kw, kb, kg, kbeta, km, kv = jax.random.split(key, 7)

    x = jax.random.normal(kx, (B, channels, T), jnp.float32)

    # Conv1d params (kaiming-uniform-like bound = 1/sqrt(fan_in)).
    bound = 1.0 / np.sqrt(width * kernels)
    weights = jax.random.uniform(kw, (nums, width, width, kernels),
                                 jnp.float32, -bound, bound)
    biases = jax.random.uniform(kb, (nums, width), jnp.float32, -bound, bound)

    # BatchNorm1d params + running stats (deterministic, inference mode).
    gamma = 1.0 + 0.1 * jax.random.normal(kg, (nums, width), jnp.float32)
    beta = 0.1 * jax.random.normal(kbeta, (nums, width), jnp.float32)
    running_mean = 0.1 * jax.random.normal(km, (nums, width), jnp.float32)
    running_var = 1.0 + 0.5 * jax.random.uniform(kv, (nums, width), jnp.float32)
    bn_scale = gamma / jnp.sqrt(running_var + eps)
    bn_shift = beta - running_mean * bn_scale

    # Reference first (x is aliased/donated into the kernel output).
    ref = res2block_reference(x, weights, biases, bn_scale, bn_shift,
                              scale=scale, kernels=kernels, dilation=dilation)
    ref = jax.block_until_ready(ref)

    out = res2block_pallas(x, weights, biases, bn_scale, bn_shift,
                           scale=scale, kernels=kernels, dilation=dilation,
                           batch_block=2)
    out = jax.block_until_ready(out)

    assert out.shape == (B, channels, T), out.shape
    # Tolerance loosened vs. the f32 version: the conv matmuls now use bf16
    # operands (f32 accumulation), the reference uses Precision.HIGHEST f32.
    np.testing.assert_allclose(np.asarray(out), np.asarray(ref),
                               rtol=3e-2, atol=3e-2)
    print("KERNEL_OK")
</pallas_src>

<mosaic_0001>
module attributes {stable_mosaic.version = 11 : i64} {
  func.func @_res2block_kernel(%arg0: i32, %arg1: memref<2x32x128xf32, #tpu.memory_space<vmem>>, %arg2: memref<3x24x24xbf16, #tpu.memory_space<vmem>>, %arg3: memref<24x1xf32, #tpu.memory_space<vmem>>, %arg4: memref<24x1xf32, #tpu.memory_space<vmem>>, %arg5: memref<24x1xf32, #tpu.memory_space<vmem>>, %arg6: memref<2x8x128xf32, #tpu.memory_space<vmem>>) attributes {dimension_semantics = [#tpu.dimension_semantics<parallel>], iteration_bounds = array<i64: 2>, scalar_prefetch = 0 : i64, scratch_operands = 0 : i64, tpu.core_type = #tpu.core_type<tc>, window_params = [{transform_indices = @transform_0, window_bounds = array<i64: 2, 32, 128>}, {pipeline_mode = #tpu.pipeline_mode<synchronous>, transform_indices = @transform_1, window_bounds = array<i64: 3, 24, 24>}, {pipeline_mode = #tpu.pipeline_mode<synchronous>, transform_indices = @transform_2, window_bounds = array<i64: 24, 1>}, {pipeline_mode = #tpu.pipeline_mode<synchronous>, transform_indices = @transform_3, window_bounds = array<i64: 24, 1>}, {pipeline_mode = #tpu.pipeline_mode<synchronous>, transform_indices = @transform_4, window_bounds = array<i64: 24, 1>}, {transform_indices = @transform_5, window_bounds = array<i64: 2, 8, 128>}]} {
    %c0 = arith.constant 0 : index
    %c8 = arith.constant 8 : index
    %c0_0 = arith.constant 0 : index
    %0 = vector.load %arg1[%c0, %c8, %c0_0] : memref<2x32x128xf32, #tpu.memory_space<vmem>>, vector<1x24x128xf32>
    %1 = vector.shape_cast %0 : vector<1x24x128xf32> to vector<24x128xf32>
    %c1 = arith.constant 1 : index
    %c8_1 = arith.constant 8 : index
    %c0_2 = arith.constant 0 : index
    %2 = vector.load %arg1[%c1, %c8_1, %c0_2] : memref<2x32x128xf32, #tpu.memory_space<vmem>>, vector<1x24x128xf32>
    %3 = vector.shape_cast %2 : vector<1x24x128xf32> to vector<24x128xf32>
    %4 = tpu.concatenate %1, %3 in 1 : vector<24x128xf32>, vector<24x128xf32> -> vector<24x256xf32>
    %5 = tpu.iota {dimensions = array<i32: 1>} : vector<1x256xi32>
    %c128_i32 = arith.constant 128 : i32
    %c0_i32 = arith.constant 0 : i32
    %6 = arith.cmpi eq, %c128_i32, %c0_i32 : i32
    %c1_i32 = arith.constant 1 : i32
    %7 = arith.select %6, %c1_i32, %c128_i32 : i32
    %8 = vector.broadcast %7 : i32 to vector<1x256xi32>
    %9 = arith.remsi %5, %8 : vector<1x256xi32>
    %c0_i32_3 = arith.constant 0 : i32
    %10 = vector.broadcast %c0_i32_3 : i32 to vector<1x256xi32>
    %11 = arith.cmpi ne, %9, %10 : vector<1x256xi32>
    %c0_i32_4 = arith.constant 0 : i32
    %12 = vector.broadcast %c0_i32_4 : i32 to vector<1x256xi32>
    %13 = arith.cmpi slt, %9, %12 : vector<1x256xi32>
    %c0_i32_5 = arith.constant 0 : i32
    %14 = arith.cmpi slt, %7, %c0_i32_5 : i32
    %15 = vector.broadcast %14 : i1 to vector<1x256xi1>
    %16 = vector.broadcast %15 : vector<1x256xi1> to vector<1x256xi1>
    %17 = arith.xori %13, %16 : vector<1x256xi1>
    %18 = arith.andi %17, %11 : vector<1x256xi1>
    %19 = vector.broadcast %7 : i32 to vector<1x256xi32>
    %20 = arith.addi %9, %19 : vector<1x256xi32>
    %21 = arith.select %18, %20, %9 : vector<1x256xi1>, vector<1x256xi32>
    %cst = arith.constant 0.000000e+00 : f32
    %22 = vector.broadcast %cst : f32 to vector<24x256xf32>
    %c2_i32 = arith.constant 2 : i32
    %23 = tpu.dynamic_rotate %4 by %c2_i32 dim 1 : vector<24x256xf32>, i32 -> vector<24x256xf32>
    %c-2_i32 = arith.constant -2 : i32
    %24 = vector.broadcast %c-2_i32 : i32 to vector<1x256xi32>
    %25 = arith.addi %21, %24 : vector<1x256xi32>
    %c0_i32_6 = arith.constant 0 : i32
    %26 = vector.broadcast %c0_i32_6 : i32 to vector<1x256xi32>
    %27 = arith.cmpi sge, %25, %26 : vector<1x256xi32>
    %c-2_i32_7 = arith.constant -2 : i32
    %28 = vector.broadcast %c-2_i32_7 : i32 to vector<1x256xi32>
    %29 = arith.addi %21, %28 : vector<1x256xi32>
    %c128_i32_8 = arith.constant 128 : i32
    %30 = vector.broadcast %c128_i32_8 : i32 to vector<1x256xi32>
    %31 = arith.cmpi slt, %29, %30 : vector<1x256xi32>
    %32 = arith.andi %27, %31 : vector<1x256xi1>
    %cst_9 = arith.constant 0.000000e+00 : f32
    %33 = vector.shape_cast %32 : vector<1x256xi1> to vector<1x256xi1>
    %34 = vector.broadcast %33 : vector<1x256xi1> to vector<24x256xi1>
    %35 = vector.broadcast %cst_9 : f32 to vector<24x256xf32>
    %36 = arith.select %34, %23, %35 : vector<24x256xi1>, vector<24x256xf32>
    %c0_10 = arith.constant 0 : index
    %c0_11 = arith.constant 0 : index
    %c0_12 = arith.constant 0 : index
    %37 = vector.load %arg2[%c0_10, %c0_11, %c0_12] : memref<3x24x24xbf16, #tpu.memory_space<vmem>>, vector<1x24x24xbf16>
    %38 = vector.shape_cast %37 : vector<1x24x24xbf16> to vector<24x24xbf16>
    %39 = arith.truncf %36 : vector<24x256xf32> to vector<24x256xbf16>
    %cst_13 = arith.constant dense<0.000000e+00> : vector<24x256xf32>
    %40 = tpu.matmul %38, %39, %cst_13 {dimension_numbers = #tpu.dot_dimension_numbers<[1], [0], [0], [1], [0, 0, 1, 1], [], []>} : vector<24x24xbf16>, vector<24x256xbf16>, vector<24x256xf32> -> vector<24x256xf32>
    %41 = arith.addf %22, %40 : vector<24x256xf32>
    %c1_14 = arith.constant 1 : index
    %c0_15 = arith.constant 0 : index
    %c0_16 = arith.constant 0 : index
    %42 = vector.load %arg2[%c1_14, %c0_15, %c0_16] : memref<3x24x24xbf16, #tpu.memory_space<vmem>>, vector<1x24x24xbf16>
    %43 = vector.shape_cast %42 : vector<1x24x24xbf16> to vector<24x24xbf16>
    %44 = arith.truncf %4 : vector<24x256xf32> to vector<24x256xbf16>
    %cst_17 = arith.constant dense<0.000000e+00> : vector<24x256xf32>
    %45 = tpu.matmul %43, %44, %cst_17 {dimension_numbers = #tpu.dot_dimension_numbers<[1], [0], [0], [1], [0, 0, 1, 1], [], []>} : vector<24x24xbf16>, vector<24x256xbf16>, vector<24x256xf32> -> vector<24x256xf32>
    %46 = arith.addf %41, %45 : vector<24x256xf32>
    %c254_i32 = arith.constant 254 : i32
    %47 = tpu.dynamic_rotate %4 by %c254_i32 dim 1 : vector<24x256xf32>, i32 -> vector<24x256xf32>
    %c2_i32_18 = arith.constant 2 : i32
    %48 = vector.broadcast %c2_i32_18 : i32 to vector<1x256xi32>
    %49 = arith.addi %21, %48 : vector<1x256xi32>
    %c0_i32_19 = arith.constant 0 : i32
    %50 = vector.broadcast %c0_i32_19 : i32 to vector<1x256xi32>
    %51 = arith.cmpi sge, %49, %50 : vector<1x256xi32>
    %c2_i32_20 = arith.constant 2 : i32
    %52 = vector.broadcast %c2_i32_20 : i32 to vector<1x256xi32>
    %53 = arith.addi %21, %52 : vector<1x256xi32>
    %c128_i32_21 = arith.constant 128 : i32
    %54 = vector.broadcast %c128_i32_21 : i32 to vector<1x256xi32>
    %55 = arith.cmpi slt, %53, %54 : vector<1x256xi32>
    %56 = arith.andi %51, %55 : vector<1x256xi1>
    %cst_22 = arith.constant 0.000000e+00 : f32
    %57 = vector.shape_cast %56 : vector<1x256xi1> to vector<1x256xi1>
    %58 = vector.broadcast %57 : vector<1x256xi1> to vector<24x256xi1>
    %59 = vector.broadcast %cst_22 : f32 to vector<24x256xf32>
    %60 = arith.select %58, %47, %59 : vector<24x256xi1>, vector<24x256xf32>
    %c2 = arith.constant 2 : index
    %c0_23 = arith.constant 0 : index
    %c0_24 = arith.constant 0 : index
    %61 = vector.load %arg2[%c2, %c0_23, %c0_24] : memref<3x24x24xbf16, #tpu.memory_space<vmem>>, vector<1x24x24xbf16>
    %62 = vector.shape_cast %61 : vector<1x24x24xbf16> to vector<24x24xbf16>
    %63 = arith.truncf %60 : vector<24x256xf32> to vector<24x256xbf16>
    %cst_25 = arith.constant dense<0.000000e+00> : vector<24x256xf32>
    %64 = tpu.matmul %62, %63, %cst_25 {dimension_numbers = #tpu.dot_dimension_numbers<[1], [0], [0], [1], [0, 0, 1, 1], [], []>} : vector<24x24xbf16>, vector<24x256xbf16>, vector<24x256xf32> -> vector<24x256xf32>
    %65 = arith.addf %46, %64 : vector<24x256xf32>
    %c0_26 = arith.constant 0 : index
    %c0_27 = arith.constant 0 : index
    %66 = vector.load %arg3[%c0_26, %c0_27] : memref<24x1xf32, #tpu.memory_space<vmem>>, vector<24x1xf32>
    %67 = vector.broadcast %66 : vector<24x1xf32> to vector<24x256xf32>
    %68 = arith.addf %65, %67 : vector<24x256xf32>
    %cst_28 = arith.constant 0.000000e+00 : f32
    %69 = vector.broadcast %cst_28 : f32 to vector<24x256xf32>
    %70 = arith.maximumf %68, %69 : vector<24x256xf32>
    %c0_29 = arith.constant 0 : index
    %c0_30 = arith.constant 0 : index
    %71 = vector.load %arg4[%c0_29, %c0_30] : memref<24x1xf32, #tpu.memory_space<vmem>>, vector<24x1xf32>
    %72 = vector.broadcast %71 : vector<24x1xf32> to vector<24x256xf32>
    %73 = arith.mulf %70, %72 : vector<24x256xf32>
    %c0_31 = arith.constant 0 : index
    %c0_32 = arith.constant 0 : index
    %74 = vector.load %arg5[%c0_31, %c0_32] : memref<24x1xf32, #tpu.memory_space<vmem>>, vector<24x1xf32>
    %75 = vector.broadcast %74 : vector<24x1xf32> to vector<24x256xf32>
    %76 = arith.addf %73, %75 : vector<24x256xf32>
    %c0_33 = arith.constant 0 : index
    %c0_34 = arith.constant 0 : index
    %c0_35 = arith.constant 0 : index
    %77 = vector.load %arg1[%c0_33, %c0_34, %c0_35] : memref<2x32x128xf32, #tpu.memory_space<vmem>>, vector<1x8x128xf32>
    %78 = vector.shape_cast %77 : vector<1x8x128xf32> to vector<8x128xf32>
    %79 = vector.extract_strided_slice %76 {offsets = [0, 0], sizes = [8, 128], strides = [1, 1]} : vector<24x256xf32> to vector<8x128xf32>
    %80 = arith.addf %78, %79 : vector<8x128xf32>
    %81 = vector.extract_strided_slice %76 {offsets = [8, 0], sizes = [8, 128], strides = [1, 1]} : vector<24x256xf32> to vector<8x128xf32>
    %82 = arith.addf %80, %81 : vector<8x128xf32>
    %83 = vector.extract_strided_slice %76 {offsets = [16, 0], sizes = [8, 128], strides = [1, 1]} : vector<24x256xf32> to vector<8x128xf32>
    %84 = arith.addf %82, %83 : vector<8x128xf32>
    %c0_36 = arith.constant 0 : index
    %c0_37 = arith.constant 0 : index
    %c0_38 = arith.constant 0 : index
    %85 = vector.load %arg6[%c0_36, %c0_37, %c0_38] : memref<2x8x128xf32, #tpu.memory_space<vmem>>, vector<1x8x128xf32>
    %86 = vector.shape_cast %85 : vector<1x8x128xf32> to vector<8x128xf32>
    %87 = vector.shape_cast %84 : vector<8x128xf32> to vector<1x8x128xf32>
    tpu.vector_store %arg6[%c0_36, %c0_37, %c0_38], %87 {strides = array<i32>} : memref<2x8x128xf32, #tpu.memory_space<vmem>>, vector<1x8x128xf32>,
    %c1_39 = arith.constant 1 : index
    %c0_40 = arith.constant 0 : index
    %c0_41 = arith.constant 0 : index
    %88 = vector.load %arg1[%c1_39, %c0_40, %c0_41] : memref<2x32x128xf32, #tpu.memory_space<vmem>>, vector<1x8x128xf32>
    %89 = vector.shape_cast %88 : vector<1x8x128xf32> to vector<8x128xf32>
    %90 = vector.extract_strided_slice %76 {offsets = [0, 128], sizes = [8, 128], strides = [1, 1]} : vector<24x256xf32> to vector<8x128xf32>
    %91 = arith.addf %89, %90 : vector<8x128xf32>
    %92 = vector.extract_strided_slice %76 {offsets = [8, 128], sizes = [8, 128], strides = [1, 1]} : vector<24x256xf32> to vector<8x128xf32>
    %93 = arith.addf %91, %92 : vector<8x128xf32>
    %94 = vector.extract_strided_slice %76 {offsets = [16, 128], sizes = [8, 128], strides = [1, 1]} : vector<24x256xf32> to vector<8x128xf32>
    %95 = arith.addf %93, %94 : vector<8x128xf32>
    %c1_42 = arith.constant 1 : index
    %c0_43 = arith.constant 0 : index
    %c0_44 = arith.constant 0 : index
    %96 = vector.load %arg6[%c1_42, %c0_43, %c0_44] : memref<2x8x128xf32, #tpu.memory_space<vmem>>, vector<1x8x128xf32>
    %97 = vector.shape_cast %96 : vector<1x8x128xf32> to vector<8x128xf32>
    %98 = vector.shape_cast %95 : vector<8x128xf32> to vector<1x8x128xf32>
    tpu.vector_store %arg6[%c1_42, %c0_43, %c0_44], %98 {strides = array<i32>} : memref<2x8x128xf32, #tpu.memory_space<vmem>>, vector<1x8x128xf32>,
    return
  }
  func.func @transform_0(%arg0: i32) -> (i32, i32, i32) {
    %c0_i32 = arith.constant 0 : i32
    %c0_i32_0 = arith.constant 0 : i32
    %c0_i32_1 = arith.constant 0 : i32
    return %arg0, %c0_i32, %c0_i32_0 : i32, i32, i32
  }
  func.func @transform_1(%arg0: i32) -> (i32, i32, i32) {
    %c0_i32 = arith.constant 0 : i32
    %c0_i32_0 = arith.constant 0 : i32
    %c0_i32_1 = arith.constant 0 : i32
    %c0_i32_2 = arith.constant 0 : i32
    return %c0_i32, %c0_i32_0, %c0_i32_1 : i32, i32, i32
  }
  func.func @transform_2(%arg0: i32) -> (i32, i32) {
    %c0_i32 = arith.constant 0 : i32
    %c0_i32_0 = arith.constant 0 : i32
    %c0_i32_1 = arith.constant 0 : i32
    return %c0_i32, %c0_i32_0 : i32, i32
  }
  func.func @transform_3(%arg0: i32) -> (i32, i32) {
    %c0_i32 = arith.constant 0 : i32
    %c0_i32_0 = arith.constant 0 : i32
    %c0_i32_1 = arith.constant 0 : i32
    return %c0_i32, %c0_i32_0 : i32, i32
  }
  func.func @transform_4(%arg0: i32) -> (i32, i32) {
    %c0_i32 = arith.constant 0 : i32
    %c0_i32_0 = arith.constant 0 : i32
    %c0_i32_1 = arith.constant 0 : i32
    return %c0_i32, %c0_i32_0 : i32, i32
  }
  func.func @transform_5(%arg0: i32) -> (i32, i32, i32) {
    %c0_i32 = arith.constant 0 : i32
    %c0_i32_0 = arith.constant 0 : i32
    %c0_i32_1 = arith.constant 0 : i32
    return %arg0, %c0_i32, %c0_i32_0 : i32, i32, i32
  }
}

</mosaic_0001>

<bundles_post_ra>
// kernel: tpu_custom_call.1
= control target key start
LH: loop header
LB: loop body
LE: loop exit
PB: predicated region body
PF: predicated region fallthrough
CT: control target
= control target key end

     0   :  { %10 = vsyncpa [#allocation3], 0  ;;  %s1339_s0 = inlined_call_operand.hbm [shape: f32[4,32,128], index: 0, kind: input, shape index: {}, may-alias: {0,5}]   ;;  %s1340_s1 = inlined_call_operand.vmem [shape: bf16[3,24,24], index: 1, kind: input, shape index: {}]   ;;  %s1341_s2 = inlined_call_operand.vmem [shape: f32[24,1], index: 2, kind: input, shape index: {}]   ;;  %s1342_s3 = inlined_call_operand.vmem [shape: f32[24,1], index: 3, kind: input, shape index: {}]   ;;  %s1343_s4 = inlined_call_operand.vmem [shape: f32[24,1], index: 4, kind: input, shape index: {}]   ;;  %s1344_s5 = inlined_call_operand.hbm [shape: f32[4,32,128], index: 5, kind: output, shape index: {}, may-alias: {0,5}]  }
   0x1   :  { %12 = vsyncpa [#allocation3 + $0x1], 0 }
   0x2   :  { %13 = vsyncpa [#allocation4], 0 }
   0x3   :  { %15 = vsyncpa [#allocation4 + $0x1], 0  ;;  %s1076_s18 = smov 0   ;;  %s1078_s19 = smov 0  }
   0x4   :  { %s1080_s20 = smov 0   ;;  %s1082_s21 = smov 0  }
   0x5 LB: > { %s1097_s22 = sadd.s32 4294967295, %s1034_s21   ;;  %s776_s23 = sadd.s32 4294967294, %s1034_s21   ;;  %s1034_s21 = sphi %s1082_s21, %s1357_s21   ;;  %s1030_s20 = sphi %s1080_s20, %s1356_s20   ;;  %s1026_s19 = sphi %s1078_s19, %s1355_s19   ;;  %s1022_s18 = sphi %s1076_s18, %s1354_s18  }
   0x6   : > { %s1101_s24 = sadd.s32 1, %s1034_s21   ;;  %s28_s25 = sadd.s32 1, %s1030_s20 }
   0x7   : > { %s25_s26 = ssub.s32 %s1034_s21, %s1101_s24  ;;  %p35_p0 = scmp.ne.s32.totalorder %s1030_s20, %s1026_s19 }
   0x8   : > { %p26_p1 = scmp.eq.s32.totalorder %s25_s26, 0  ;;  %p36_p2 = scmp.eq.s32.totalorder %s1034_s21, 0 }
   0x9   : > { %p41_p3 = scmp.ne.s32.totalorder %s1026_s19, %s1022_s18  ;;  %p42_p4 = scmp.eq.s32.totalorder %s1097_s22, 0 }
   0xa   : > { %s1113_s27 = scalar_select %p26_p1, %s1030_s20, %s28_s25  }
   0xb   : > { %p1115_p5 = por %p36_p2, %p35_p0  ;;  %p1119_p6 = por %p42_p4, %p41_p3 }
   0xc   : > { %p149_p7 = scmp.eq.s32.totalorder %s1097_s22, 1  ;;  %p155_p8 = scmp.eq.s32.totalorder %s776_s23, 1 }
   0xd   : > { %p858_p10 = scmp.lt.s32.totalorder %s1034_s21, 2  ;;  %s187_s7 = sand.u32 1, %s1030_s20  }
   0xe   : > { %p1126_p11 = por %p149_p7, %p35_p0  ;;  %p1130_p12 = por %p155_p8, %p41_p3 }
   0xf   : > { %s831_s8 = sshll.u32 %s1034_s21, 10  ;;  %s779_s9 = sshll.u32 %s187_s7, 6 }
  0x10   : > { %s1348_s30 = scalar_select %p1126_p11, 1, 0 }
  0x11   : > { %s1349_s6 = scalar_select %p1130_p12, 1, 0 }
  0x12   : > { %s1139_s12 = scalar_lea.hbm %s1339_s0, %s831_s8  ;;  %s191_s13 = scalar_lea.vmem [#allocation2], %s779_s9 }
  0x13   : > { %s199_s14 = sshll.u32 %s191_s13, 4  ;;  %p1143_p13 = pnand %p858_p10, %p1115_p5  ;;  %s1147_s14 = int_to_ptr.vmem [resolvable:$true] %s199_s14 }
  0x14   : > { %s1149_s16 = scalar_lea.sflag [#allocation3], %s187_s7  ;;  %s938_s17 = scalar_lea.hbm %s1139_s12, 1024 }
  0x15   : > { %p939_p0 = scmp.ne.s32.totalorder %s1139_s12, %s938_s17  ;;  %p940_p1 = pneg %p1143_p13 }
  0x16   : > { %s943_s26 = scalar_lea.hbm %s1339_s0, 2048  ;;  %p944_p4 = scmp.lt.u32.totalorder %s1139_s12, %s1339_s0 }
  0x17   : > { %p941_p2 = pnand %p940_p1, %p939_p0  ;;  %p945_p5 = scmp.lt.u32.totalorder %s943_s26, %s938_s17 }
  0x18   : > { %p947_p8 = scmp.lt.u32.totalorder %s938_s17, %s1139_s12 }
  0x19   : > { %p942_p3 = pneg %p941_p2  ;;  %p946_p7 = por %p945_p5, %p944_p4 }
  0x1b   : > { %p948_p10 = por %p947_p8, %p946_p7 }
  0x1d   : > { %p949_p9 = pnand %p948_p10, %p942_p3 }
  0x1f   : > { %952 = shalt.err (!%p949_p9)
}
  0x20   : > { %s953_s7 = scalar_lea.vmem %s1147_s14, 1024  ;;  %s1036_s9 = smov [#allocation2]  }
  0x21   : > { %p954_p0 = scmp.ne.s32.totalorder %s1147_s14, %s953_s7  ;;  %s958_s10 = sshll.u32 %s1036_s9, 4  ;;  %s959_s10 = int_to_ptr.vmem [resolvable:$false] %s958_s10 }
  0x22   : > { %s960_s11 = scalar_lea.vmem %s959_s10, 2048  ;;  %p961_p11 = scmp.lt.s32.totalorder %s1147_s14, %s959_s10 }
  0x23   : > { %p956_p2 = pnand %p954_p0, %p940_p1  ;;  %p962_p4 = scmp.lt.s32.totalorder %s960_s11, %s953_s7 }
  0x25   : > { %p957_p12 = pneg %p956_p2  ;;  %p963_p5 = por %p962_p4, %p961_p11 }
  0x27   : > { %p964_p7 = pnand %p963_p5, %p957_p12 }
  0x29   : > { %967 = shalt.err (!%p964_p7)
}
  0x2a   : > { %s1037_s13 = smov 128   ;;  %s1038_s17 = smov 8  }
  0x2b   : > { %853 = dma.hbm_to_vmem [thread:$0]  (!%p1143_p13), %s1139_s12, 1024, %s1147_s14, %s1149_s16, %s1037_s13, %s1037_s13, %s1038_s17  }
  0x2c   : > { %p783_p9 = scmp.ge.s32.totalorder %s1034_s21, 1  ;;  %p207_p1 = scmp.lt.s32.totalorder %s1034_s21, 3 }
  0x2e   : > { %p208_p3 = pnand %p783_p9, %p207_p1 }
  0x2f   : > { %s1180_s23 = sand.u32 (!%p208_p3), 1, %s1026_s19  }
  0x30   : > { %211 = sbr.rel (%p208_p3) target bundleno = 452 (0x1c4), region = 40  ;;  %s784_s25 = sshll.u32 (!%p208_p3), %s1180_s23, 6 }
  0x31   : > { %s214_s26 = scalar_lea.sflag (!%p208_p3), [#allocation3], %s1180_s23  ;;  %s1184_s28 = scalar_lea.vmem (!%p208_p3), [#allocation2], %s784_s25 }
  0x37   : > { %1013 = dma.done.wait (%p1119_p6), %s214_s26, 1024  }
  0x38   : > { %1015 = vsyncadd (%p1119_p6), %s214_s26, 4294966272  ;;  %v1039_v0 = vmov 0   ;;  %v247_v1 = vld [vmem:[%s1184_s28 + $0x8] sm:$0xff]  ;;  %v248_v2 = vld [vmem:[%s1184_s28 + $0x10] sm:$0xff]  ;;  %s1040_s29 = smov 2   ;;  %vm348_vm0 = vcmask 1043456   ;;  %v254_v26 = vlaneseq }
  0x39   : > { %387 = vmatprep.mubr.bf16.mxu1 %v1039_v0  ;;  %458 = vmatprep.mubr.bf16.mxu0 %v1039_v0  ;;  %v786_v3 = vld [vmem:[%s1184_s28 + $0x28] sm:$0xff]  ;;  %v900_v4 = vpack.i.bf16 %v248_v2, %v247_v1  ;;  %v787_v5 = vld [vmem:[%s1184_s28 + $0x30] sm:$0xff]  ;;  %v249_v6 = vld [vmem:[%s1184_s28 + $0x18] sm:$0xff]  ;;  %v329_v9 = vpack.c.bf16 %v248_v2, %v247_v1  ;;  %s1041_s12 = smov 126   ;;  %vm341_vm1 = vcmask 195584   ;;  %s785_s16 = sshll.u32 %s1180_s23, 4 }
  0x3a   : > { %931 = vset.pattern.permute.xlu1 %v1039_v0  ;;  %930 = vset.pattern.permute.xlu0 %v1039_v0  ;;  %v788_v7 = vld [vmem:[%s1184_s28 + $0x38] sm:$0xff]  ;;  %v905_v10 = vpack.i.bf16 %v787_v5, %v786_v3  ;;  %v330_v12 = vpack.c.bf16 %v787_v5, %v786_v3  ;;  %v331_v13 = vpack.c.bf16 %v249_v6, %v249_v6  ;;  %v932_v15 = vld [vmem:[%s1340_s1 + $0xc] sm:$0xff]   ;;  %v934_v16 = vld [vmem:[%s1340_s1 + $0x14] ss:$0 sps:$4 sm:$0xff]   ;;  %v255_v27 = vand.u32 127, %v254_v26  ;;  %s833_s7 = sshll.u32 %s1097_s22, 10 }
  0x3b   : > { %v910_v8 = vpack.i.bf16 %v788_v7, %v249_v6  ;;  %901 = vrot.lane.b32.xlu0 %v900_v4, %s1040_s29  ;;  %v332_v11 = vpack.c.bf16 %v788_v7, %v788_v7  ;;  %v600_v17 = vld [vmem:[%s1341_s2 + $0x8] sm:$0xff]  ;;  %v599_v18 = vld [vmem:[%s1341_s2] sm:$0xff]  ;;  %v601_v19 = vld [vmem:[%s1341_s2 + $0x10] sm:$0xff]  ;;  %s1295_s11 = scalar_lea.hbm %s1344_s5, %s833_s7  ;;  %s689_s13 = scalar_lea.sflag [#allocation4], %s1180_s23 }
  0x3c   : > { %355 = vmatprep.subr.bf16.mxu1 %v330_v12  ;;  %v350_v14 = vsel %vm348_vm0, %v331_v13, 0  ;;  %v629_v20 = vld [vmem:[%s1342_s3] sm:$0xff]  ;;  %v630_v21 = vld [vmem:[%s1342_s3 + $0x8] sm:$0xff]  ;;  %v631_v23 = vld [vmem:[%s1342_s3 + $0x10] sm:$0xff]  ;;  %v256_v28 = vadd.s32 128, %v255_v27  ;;  %v300_v30 = vadd.s32 4294967294, %v255_v27 }
  0x3d   : > { %911 = vrot.lane.b32.xlu1 %v910_v8, %s1040_s29  ;;  %356 = vmatpush1.bf16.msra.mxu1 %v329_v9  ;;  %v653_v22 = vld [vmem:[%s1343_s4] sm:$0xff]  ;;  %v654_v24 = vld [vmem:[%s1343_s4 + $0x8] sm:$0xff]  ;;  %v655_v25 = vld [vmem:[%s1343_s4 + $0x10] sm:$0xff]  ;;  %vm293_vm3 = vcmp.lt.s32.totalorder %v255_v27, 2  ;;  %vm489_vm5 = vcmp.lt.s32.totalorder %v255_v27, 126  ;;  %v496_v49 = vadd.s32 2, %v255_v27 }
  0x3e   : > { %794 = vmatprep.subr.msk.bf16.mxu1 %vm348_vm0, %v332_v11  ;;  %v268_v29 = vand.u32 127, %v256_v28  ;;  %vm302_vm2 = vcmp.ge.s32.totalorder %v300_v30, 0  ;;  %v935_v12 = vld [vmem:[%s1340_s1 + $0x8] ss:$0 sps:$4 sm:$0xff]   ;;  %p1351_p11 = scmp.ne.s32.totalorder %s1348_s30, 0  ;;  %s1042_s22 = smov [#allocation5]  }
  0x3f   : > { %906 = vrot.lane.b32.xlu0 %v905_v10, %s1040_s29  ;;  %vm802_vm7 = vmpackc.low %vm302_vm2, %vm302_vm2  ;;  %vm500_vm9 = vcmp.lt.s32.totalorder %v496_v49, 128  ;;  %s972_s25 = sshll.u32 %s1042_s22, 4  ;;  %s973_s25 = int_to_ptr.vmem [resolvable:$false] %s972_s25 }
  0x40   : > { %v301_v31 = vadd.s32 4294967294, %v268_v29  ;;  %v497_v48 = vadd.s32 2, %v268_v29  ;;  %vm816_vm11 = vmpackc.low %vm500_vm9, %vm500_vm9  ;;  %s974_s26 = scalar_lea.vmem %s973_s25, 512 }
  0x41   : > { %916 = vrot.lane.b32.xlu1 %v900_v4, %s1041_s12  ;;  %358 = vmatpush1.bf16.msra.mxu1 %v350_v14 }
  0x42   : > { %vm303_vm4 = vcmp.ge.s32.totalorder %v301_v31, 0  ;;  %vm501_vm8 = vcmp.lt.s32.totalorder %v497_v48, 128 }
  0x43   : > { %921 = vrot.lane.b32.xlu0 %v905_v10, %s1041_s12  ;;  %vm799_vm6 = vmpackc.low %vm303_vm4, %vm303_vm4  ;;  %v933_v10 = vld [vmem:[%s1340_s1] sm:$0xff]  }
  0x44   : > { %795 = vmatmul.mubr.msk.bf16.vlgmr.msra.gmra.mrb[0].mxu1 %vm341_vm1, %v932_v15  ;;  %vm813_vm10 = vmpackc.low %vm501_vm8, %vm501_vm8 }
  0x45   : > { %926 = vrot.lane.b32.xlu1 %v910_v8, %s1041_s12  ;;  %397 = vmatprep.mubr.bf16.mxu1 %v1039_v0 }
  0x47   : > { %604 = vperm.xlu0 %930, %v599_v18   ;;  %v937_v18 = vld [vmem:[%s1340_s1 + $0x20] ss:$0 sps:$4 sm:$0xff]  }
  0x49   : > { %609 = vperm.xlu1 %931, %v600_v17   ;;  %v936_v17 = vld [vmem:[%s1340_s1 + $0x18] sm:$0xff]  }
  0x4b   : > { %634 = vperm.xlu0 %930, %v629_v20  }
  0x4c   : > { %796 = vmatmul.mubr.msk.bf16.gmra.mrb[4].mxu1 %vm341_vm1, %v934_v16 }
  0x4d   : > { %468 = vmatprep.mubr.bf16.mxu1 %v1039_v0  ;;  %614 = vperm.xlu1 %931, %v601_v19  }
  0x4f   : > { %658 = vperm.xlu0 %930, %v653_v22  }
  0x51   : > { %639 = vperm.xlu1 %931, %v630_v21  }
  0x53   : > { %663 = vperm.xlu0 %930, %v654_v24  }
  0x55   : > { %644 = vperm.xlu1 %931, %v631_v23  }
  0x59   : > { %668 = vperm.xlu1 %931, %v655_v25  }
  0xad   : > { %v902_v32 = vpop.permute.xlu0 %901 }
  0xae   : > { %v904_v36 = vunpack.i.h.bf16 %v902_v32  ;;  %v903_v37 = vunpack.i.l.bf16 %v902_v32 }
  0xaf   : > { %v912_v33 = vpop.permute.xlu1 %911 }
  0xb0   : > { %v914_v34 = vunpack.i.h.bf16 %v912_v33  ;;  %v913_v35 = vunpack.i.l.bf16 %v912_v33 }
  0xb1   : > { %v907_v38 = vpop.permute.xlu0 %906 }
  0xb2   : > { %v296_v39 = vsel %vm293_vm3, %v913_v35, %v914_v34  ;;  %v299_v40 = vsel %vm293_vm3, %v914_v34, %v913_v35  ;;  %v909_v41 = vunpack.i.h.bf16 %v907_v38  ;;  %v908_v42 = vunpack.i.l.bf16 %v907_v38 }
  0xb3   : > { %v317_v43 = vsel %vm303_vm4, %v296_v39, 0.0  ;;  %v316_v44 = vsel %vm302_vm2, %v299_v40, 0.0  ;;  %v917_v45 = vpop.permute.xlu1 %916 }
  0xb4   : > { %v324_v46 = vpack.c.bf16 %v317_v43, %v317_v43  ;;  %v919_v47 = vunpack.i.h.bf16 %v917_v45  ;;  %v294_v50 = vsel %vm293_vm3, %v903_v37, %v908_v42  ;;  %v295_v51 = vsel %vm293_vm3, %v904_v36, %v909_v41 }
  0xb5   : > { %v297_v52 = vsel %vm293_vm3, %v908_v42, %v903_v37  ;;  %v298_v53 = vsel %vm293_vm3, %v909_v41, %v904_v36  ;;  %v800_v54 = vpack.c.bf16 %v295_v51, %v294_v50  ;;  %v918_v56 = vunpack.i.l.bf16 %v917_v45  ;;  %v922_v57 = vpop.permute.xlu0 %921 }
  0xb6   : > { %v803_v55 = vpack.c.bf16 %v298_v53, %v297_v52  ;;  %v323_v58 = vpack.c.bf16 %v316_v44, %v316_v44  ;;  %v924_v59 = vunpack.i.h.bf16 %v922_v57  ;;  %v923_v60 = vunpack.i.l.bf16 %v922_v57 }
  0xb7   : > { %v927_v61 = vpop.permute.xlu1 %926  ;;  %801 = vmatprep.subr.msk.bf16.mxu0 %vm799_vm6, %v800_v54  ;;  %834 = vmatprep.subr.msk.bf16.mxu1 %vm799_vm6, %v800_v54 }
  0xb8   : > { %v929_v62 = vunpack.i.h.bf16 %v927_v61  ;;  %v928_v63 = vunpack.i.l.bf16 %v927_v61  ;;  %804 = vmatpush1.bf16.msk.msra.mxu0 %vm802_vm7, %v803_v55  ;;  %836 = vmatpush1.bf16.msk.msra.mxu1 %vm802_vm7, %v803_v55  ;;  %v491_v1 = vsel %vm489_vm5, %v919_v47, %v924_v59  ;;  %v494_v2 = vsel %vm489_vm5, %v924_v59, %v919_v47  ;;  %v822_v59 = vld [vmem:[%s1184_s28 + $0x20] sm:$0xff] }
  0xb9   : > { %v490_v3 = vsel %vm489_vm5, %v918_v56, %v923_v60  ;;  %v493_v4 = vsel %vm489_vm5, %v923_v60, %v918_v56  ;;  %805 = vmatprep.subr.msk.bf16.mxu0 %vm348_vm0, %v324_v46  ;;  %835 = vmatprep.subr.msk.bf16.mxu1 %vm348_vm0, %v324_v46  ;;  %v421_v5 = vsel %vm348_vm0, %v323_v58, 0  ;;  %v677_v56 = vld [vmem:[%s1184_s28] sm:$0xff]  ;;  %s243_s28 = scalar_lea.vmem [#allocation5], %s785_s16 }
  0xba   : > { %v492_v6 = vsel %vm489_vm5, %v928_v63, %v929_v62  ;;  %v814_v7 = vpack.c.bf16 %v494_v2, %v493_v4  ;;  %v495_v8 = vsel %vm489_vm5, %v929_v62, %v928_v63  ;;  %v817_v13 = vpack.c.bf16 %v491_v1, %v490_v3  ;;  %s703_s8 = sshll.u32 %s243_s28, 4  ;;  %s1290_s8 = int_to_ptr.vmem [resolvable:$true] %s703_s8 }
  0xbb   : > { %v512_v9 = vsel %vm500_vm9, %v492_v6, 0.0  ;;  %v513_v11 = vsel %vm501_vm8, %v495_v8, 0.0  ;;  %s968_s17 = scalar_lea.vmem %s1290_s8, 256  ;;  %p975_p8 = scmp.lt.s32.totalorder %s1290_s8, %s973_s25 }
  0xbc   : > { %429 = vmatpush1.bf16.msra.mxu0 %v421_v5  ;;  %837 = vmatpush1.bf16.msra.mxu1 %v421_v5  ;;  %v521_v14 = vpack.c.bf16 %v513_v11, %v513_v11  ;;  %v520_v15 = vpack.c.bf16 %v512_v9, %v512_v9  ;;  %p969_p6 = scmp.ne.s32.totalorder %s1290_s8, %s968_s17  ;;  %p976_p10 = scmp.lt.s32.totalorder %s974_s26, %s968_s17 }
  0xbd   : > { %815 = vmatprep.subr.msk.bf16.mxu0 %vm813_vm10, %v814_v7 }
  0xbe   : > { %v537_v16 = vsel %vm348_vm0, %v520_v15, 0  ;;  %p970_p12 = pnand %p969_p6, %p1351_p11  ;;  %p977_p0 = por %p976_p10, %p975_p8 }
  0xbf   : > { %806 = vmatmul.mubr.msk.bf16.vlgmr.msra.gmra.mrb[0].mxu0 %vm341_vm1, %v933_v10  ;;  %807 = vmatmul.mubr.msk.bf16.vlgmr.msra.gmra.mrb[8].mxu1 %vm341_vm1, %v935_v12 }
  0xc0   : > { %818 = vmatpush1.bf16.msk.msra.mxu0 %vm816_vm11, %v817_v13  ;;  %574 = vmatprep.mubr.bf16.mxu0 %v1039_v0  ;;  %p971_p13 = pneg %p970_p12 }
  0xc1   : > { %819 = vmatprep.subr.msk.bf16.mxu0 %vm348_vm0, %v521_v14 }
  0xc2   : > { %p978_p2 = pnand %p977_p0, %p971_p13 }
  0xc4   : > { %545 = vmatpush1.bf16.msra.mxu0 %v537_v16 }
  0xc6   : > { %v605_v33 = vpop.permute.xlu0 %604 }
  0xca   : > { %v635_v35 = vpop.permute.xlu0 %634 }
  0xcb   : > { %820 = vmatmul.mubr.msk.bf16.vlgmr.msra.gmra.mrb[0].mxu0 %vm341_vm1, %v936_v17 }
  0xcc   : > { %584 = vmatprep.mubr.bf16.mxu0 %v1039_v0  ;;  %v610_v0 = vpop.permute.xlu1 %609 }
  0xce   : > { %v659_v45 = vpop.permute.xlu0 %658 }
  0xd0   : > { %v615_v34 = vpop.permute.xlu1 %614 }
  0xd2   : > { %v664_v1 = vpop.permute.xlu0 %663 }
  0xd3   : > { %821 = vmatmul.mubr.msk.bf16.gmra.mrb[4].mxu0 %vm341_vm1, %v937_v18 }
  0xd4   : > { %v640_v41 = vpop.permute.xlu1 %639 }
  0xd8   : > { %v645_v58 = vpop.permute.xlu1 %644 }
  0xdc   : > { %v669_v18 = vpop.permute.xlu1 %668 }
 0x117   : > { %v389_v19 = vpop.f32.mrb[0].mxu1 }
 0x118   : > { %v391_v20 = vpop.f32.mrb[1].mxu1 }
 0x119   : > { %v393_v21 = vpop.f32.mrb[2].mxu1 }
 0x11a   : > { %v395_v22 = vpop.f32.mrb[3].mxu1 }
 0x11f   : > { %v399_v23 = vpop.f32.mrb[4].mxu1 }
 0x120   : > { %v401_v24 = vpop.f32.mrb[5].mxu1 }
 0x121   : > { %v403_v25 = vpop.f32.mrb[6].mxu1 }
 0x122   : > { %v404_v26 = vpop.f32.mrb[7].mxu1 }
 0x192   : > { %v470_v27 = vpop.f32.mrb[8].mxu1 }
 0x193   : > { %v471_v28 = vadd.f32 %v470_v27, %v399_v23  ;;  %v472_v29 = vpop.f32.mrb[9].mxu1 }
 0x194   : > { %v473_v30 = vadd.f32 %v472_v29, %v401_v24  ;;  %v474_v31 = vpop.f32.mrb[10].mxu1 }
 0x195   : > { %v475_v32 = vpop.f32.mrb[11].mxu1 }
 0x19e   : > { %v576_v36 = vpop.f32.mrb[0].mxu0 }
 0x19f   : > { %v838_v37 = vadd.f32 %v576_v36, %v389_v19  ;;  %v578_v38 = vpop.f32.mrb[1].mxu0 }
 0x1a0   : > { %v839_v39 = vadd.f32 %v578_v38, %v391_v20  ;;  %v580_v40 = vpop.f32.mrb[2].mxu0 }
 0x1a1   : > { %v617_v42 = vadd.f32 %v838_v37, %v605_v33  ;;  %v840_v43 = vadd.f32 %v580_v40, %v393_v21  ;;  %v582_v44 = vpop.f32.mrb[3].mxu0 }
 0x1a2   : > { %v618_v46 = vadd.f32 %v839_v39, %v605_v33  ;;  %v841_v47 = vadd.f32 %v582_v44, %v395_v22 }
 0x1a3   : > { %v623_v48 = vmax.f32 %v617_v42, 0.0  ;;  %v619_v49 = vadd.f32 %v840_v43, %v610_v0 }
 0x1a4   : > { %v624_v50 = vmax.f32 %v618_v46, 0.0  ;;  %v620_v51 = vadd.f32 %v841_v47, %v610_v0 }
 0x1a5   : > { %v647_v52 = vmul.f32 %v635_v35, %v623_v48  ;;  %v625_v53 = vmax.f32 %v619_v49, 0.0 }
 0x1a6   : > { %v648_v54 = vmul.f32 %v635_v35, %v624_v50  ;;  %v626_v55 = vmax.f32 %v620_v51, 0.0  ;;  %v586_v57 = vpop.f32.mrb[4].mxu0 }
 0x1a7   : > { %v649_v60 = vmul.f32 %v640_v41, %v625_v53  ;;  %v671_v61 = vadd.f32 %v659_v45, %v647_v52  ;;  %v597_v62 = vadd.f32 %v586_v57, %v471_v28  ;;  %v588_v63 = vpop.f32.mrb[5].mxu0 }
 0x1a8   : > { %v650_v2 = vmul.f32 %v640_v41, %v626_v55  ;;  %v672_v3 = vadd.f32 %v659_v45, %v648_v54  ;;  %v598_v4 = vadd.f32 %v588_v63, %v473_v30  ;;  %v590_v5 = vpop.f32.mrb[6].mxu0 }
 0x1a9   : > { %v673_v6 = vadd.f32 %v664_v1, %v649_v60  ;;  %v678_v7 = vadd.f32 %v677_v56, %v671_v61  ;;  %v621_v8 = vadd.f32 %v615_v34, %v597_v62  ;;  %v591_v9 = vpop.f32.mrb[7].mxu0 }
 0x1aa   : > { %v674_v10 = vadd.f32 %v664_v1, %v650_v2  ;;  %v683_v11 = vadd.f32 %v822_v59, %v672_v3  ;;  %v622_v12 = vadd.f32 %v615_v34, %v598_v4 }
 0x1ab   : > { %v679_v13 = vadd.f32 %v678_v7, %v673_v6  ;;  %v627_v14 = vmax.f32 %v621_v8, 0.0 }
 0x1ac   : > { %v684_v15 = vadd.f32 %v683_v11, %v674_v10  ;;  %v628_v16 = vmax.f32 %v622_v12, 0.0 }
 0x1ad   : > { %v651_v17 = vmul.f32 %v645_v58, %v627_v14 }
 0x1ae   : > { %v652_v19 = vmul.f32 %v645_v58, %v628_v16 }
 0x1af   : > { %v675_v20 = vadd.f32 %v669_v18, %v651_v17 }
 0x1b0   : > { %v676_v21 = vadd.f32 %v669_v18, %v652_v19 }
 0x1b1   : > { %v680_v22 = vadd.f32 %v679_v13, %v675_v20 }
 0x1b2   : > { %v685_v23 = vadd.f32 %v684_v15, %v676_v21 }
 0x1b3   : > { %681 = vst [vmem:[%s243_s28] sm:$0xff] %v680_v22 }
 0x1b4   : > { %823 = vst [vmem:[%s243_s28 + $0x8] sm:$0xff] %v685_v23 }
 0x1b5   : > { %981 = shalt.err (!%p978_p2)
}
 0x1b6   : > { %s982_s29 = scalar_lea.hbm %s1295_s11, 256  ;;  %s986_s15 = scalar_lea.hbm %s1344_s5, 2048 }
 0x1b7   : > { %p983_p4 = scmp.ne.s32.totalorder %s1295_s11, %s982_s29  ;;  %p987_p9 = scmp.lt.u32.totalorder %s1295_s11, %s1344_s5 }
 0x1b8   : > { %p988_p1 = scmp.lt.u32.totalorder %s986_s15, %s982_s29  ;;  %p990_p6 = scmp.lt.u32.totalorder %s982_s29, %s1295_s11 }
 0x1b9   : > { %p984_p5 = pnand %p983_p4, %p1351_p11 }
 0x1ba   : > { %p989_p3 = por %p988_p1, %p987_p9 }
 0x1bb   : > { %p985_p7 = pneg %p984_p5 }
 0x1bc   : > { %p991_p12 = por %p990_p6, %p989_p3 }
 0x1be   : > { %p992_p13 = pnand %p991_p12, %p985_p7 }
 0x1c0   : > { %995 = shalt.err (!%p992_p13)
}
 0x1c1   : > { %s1043_s7 = smov 128   ;;  %s1044_s9 = smov 512  }
 0x1c2   : > { %s1045_s10 = smov 8  }
 0x1c3   : > { %848 = dma.vmem_to_hbm [thread:$0]  (%p1351_p11), %s1290_s8, 256, %s1295_s11, %s689_s13, %s1043_s7, %s1044_s9, %s1045_s10  }
 0x1c4 PF: > { %s718_s17 = sand.u32 1, %s1022_s18   ;;  %p1352_p8 = scmp.ne.s32.totalorder %s1349_s6, 0 }
 0x1c5   : > { %p1353_p10 = scmp.ge.s32.totalorder %s1034_s21, 2  ;;  %s719_s22 = scalar_lea.sflag [#allocation4], %s718_s17 }
 0x1c7   : > { %p855_p0 = pnand %p1353_p10, %p1352_p8 }
 0x1c9   : > { %1017 = dma.done.wait (!%p855_p0), %s719_s22, 256  }
 0x1ca   : > { %1019 = vsyncadd (!%p855_p0), %s719_s22, 4294967040  ;;  %p18_p2 = scmp.ge.s32.totalorder %s1101_s24, 4   ;;  %s1354_s18 = smov %s1026_s19 }
 0x1cb   : > { %s1355_s19 = smov %s1030_s20  ;;  %s1356_s20 = smov %s1113_s27 }
 0x1cc   : > { %s1357_s21 = smov %s1101_s24  ;;  %20 = sbr.rel (!%p18_p2) target bundleno = 5 (0x5), region = 89 }
 0x1d3   :  { %724 = vsyncpa [#allocation3], 1 }
 0x1d4   :  { %726 = vsyncpa [#allocation3 + $0x1], 1 }
 0x1d5   :  { %727 = vsyncpa [#allocation4], 1 }
 0x1d6   :  { %729 = vsyncpa [#allocation4 + $0x1], 1 }

</bundles_post_ra>
